<compile_context>
chip_gen: v5e
topology: v5e:2x2
jax: 0.10.0
libtpu: 0.0.40
codegen_flags: <defaults>
</compile_context>

<pallas_src>
import jax
import jax.numpy as jnp
from jax.experimental import pallas as pl
from jax.experimental.pallas import tpu as pltpu


_TB_MAX = 8192  # batch columns (lanes) per grid step; sized for v7x's 64 MiB VMEM


def _round_up(n, m):
    return ((n + m - 1) // m) * m


def _mlp_kernel(x_ref, w1_ref, b1_ref, w2_ref, b2_ref, w3_ref, b3_ref, o_ref):
    # Batch-on-lanes: every activation/result has the batch tile (TB, multiple
    # of 128) as its last dim -> dense vregs, unmasked vst on the output.
    xt = x_ref[...]                                                    # (4,  TB)
    h1 = jnp.dot(w1_ref[...], xt, preferred_element_type=jnp.float32) + b1_ref[...]
    h1 = jnp.maximum(h1, 0.0)                                          # (16, TB)
    h2 = jnp.dot(w2_ref[...], h1, preferred_element_type=jnp.float32) + b2_ref[...]
    h2 = jnp.maximum(h2, 0.0)                                          # (32, TB)
    out = jnp.dot(w3_ref[...], h2, preferred_element_type=jnp.float32) + b3_ref[...]
    o_ref[...] = out.astype(o_ref.dtype)                               # (4,  TB)


def dnn_forward(x, params):
    """x: (B, 4) float32. Returns (B, 4), matching PyTorch DNN.forward(x)."""
    w1, b1 = params["w1"], params["b1"]   # (16, 4), (16,)
    w2, b2 = params["w2"], params["b2"]   # (32, 16), (32,)
    w3, b3 = params["w3"], params["b3"]   # (4, 32), (4,)

    B = x.shape[0]
    # Lane-dense tiling: batch lives on lanes -> tile must be a multiple of 128.
    TB = min(_TB_MAX, _round_up(max(B, 1), 128))
    Bp = _round_up(max(B, 1), TB)
    n_tiles = Bp // TB

    # Layout plumbing (wrapper-side, not compute): batch-on-lanes transpose + pad.
    x_t = x.T                                       # (4, B)
    if Bp != B:
        x_t = jnp.pad(x_t, ((0, 0), (0, Bp - B)))   # (4, Bp)
    # Biases as columns so they broadcast over the lane (batch) dim in-kernel.
    b1c, b2c, b3c = b1[:, None], b2[:, None], b3[:, None]

    # Weights/biases: constant index_map -> fetched once, resident across steps.
    resident = lambda shape: pl.BlockSpec(shape, lambda i: (0, 0))

    out_t = pl.pallas_call(
        _mlp_kernel,
        out_shape=jax.ShapeDtypeStruct((4, Bp), x.dtype),
        grid=(n_tiles,),
        in_specs=[
            pl.BlockSpec((4, TB), lambda i: (0, i)),     # x tile streams over batch
            resident(w1.shape), resident(b1c.shape),
            resident(w2.shape), resident(b2c.shape),
            resident(w3.shape), resident(b3c.shape),
        ],
        out_specs=pl.BlockSpec((4, TB), lambda i: (0, i)),
        compiler_params=pltpu.CompilerParams(
            dimension_semantics=("parallel",),           # shard batch tiles across TCs on v7x
            vmem_limit_bytes=32 * 1024 * 1024,           # safe on v7x's 64 MiB physical VMEM
        ),
    )(x_t, w1, b1c, w2, b2c, w3, b3c)

    return out_t[:, :B].T
    # TODO(synk): for very small batches (B << 512) plain XLA fusion beats the
    # fixed pallas_call overhead; a caller-side dispatch could pick that path.


def init_params(key):
    """Deterministic synthetic init matching the nn.Linear shapes in DNN.__init__."""
    ks = jax.random.split(key, 6)

    def lin(kw, kb, out_f, in_f):
        # PyTorch default: U(-1/sqrt(in), 1/sqrt(in))
        bound = 1.0 / jnp.sqrt(jnp.float32(in_f))
        w = jax.random.uniform(kw, (out_f, in_f), jnp.float32, -bound, bound)
        b = jax.random.uniform(kb, (out_f,), jnp.float32, -bound, bound)
        return w, b

    w1, b1 = lin(ks[0], ks[1], 16, 4)
    w2, b2 = lin(ks[2], ks[3], 32, 16)
    w3, b3 = lin(ks[4], ks[5], 4, 32)
    return {"w1": w1, "b1": b1, "w2": w2, "b2": b2, "w3": w3, "b3": b3}


def _reference(x, p):
    h1 = jnp.maximum(x @ p["w1"].T + p["b1"], 0.0)
    h2 = jnp.maximum(h1 @ p["w2"].T + p["b2"], 0.0)
    return h2 @ p["w3"].T + p["b3"]


if __name__ == "__main__":
    key = jax.random.PRNGKey(0)
    k_x1, k_x2, k_p = jax.random.split(key, 3)
    params = init_params(k_p)

    # Small batch (matches the module's trivially-small feature sizes).
    x_small = jax.random.normal(k_x1, (8, 4), jnp.float32)
    out_small = jax.block_until_ready(dnn_forward(x_small, params))
    assert out_small.shape == (8, 4)
    assert jnp.allclose(out_small, _reference(x_small, params), atol=1e-5, rtol=1e-5)

    # Non-multiple-of-128 batch to exercise the pad/slice path.
    x_odd = jax.random.normal(k_x2, (300, 4), jnp.float32)
    out_odd = jax.block_until_ready(dnn_forward(x_odd, params))
    assert out_odd.shape == (300, 4)
    assert jnp.allclose(out_odd, _reference(x_odd, params), atol=1e-5, rtol=1e-5)

    print("KERNEL_OK")
</pallas_src>

<mosaic_0001>
module attributes {stable_mosaic.version = 11 : i64} {
  func.func @_mlp_kernel(%arg0: i32, %arg1: memref<4x128xf32, #tpu.memory_space<vmem>>, %arg2: memref<16x4xf32, #tpu.memory_space<vmem>>, %arg3: memref<16x1xf32, #tpu.memory_space<vmem>>, %arg4: memref<32x16xf32, #tpu.memory_space<vmem>>, %arg5: memref<32x1xf32, #tpu.memory_space<vmem>>, %arg6: memref<4x32xf32, #tpu.memory_space<vmem>>, %arg7: memref<4x1xf32, #tpu.memory_space<vmem>>, %arg8: memref<4x128xf32, #tpu.memory_space<vmem>>) attributes {dimension_semantics = [#tpu.dimension_semantics<parallel>], iteration_bounds = array<i64: 1>, scalar_prefetch = 0 : i64, scratch_operands = 0 : i64, tpu.core_type = #tpu.core_type<tc>, window_params = [{transform_indices = @transform_0, window_bounds = array<i64: 4, 128>}, {pipeline_mode = #tpu.pipeline_mode<synchronous>, transform_indices = @transform_1, window_bounds = array<i64: 16, 4>}, {pipeline_mode = #tpu.pipeline_mode<synchronous>, transform_indices = @transform_2, window_bounds = array<i64: 16, 1>}, {pipeline_mode = #tpu.pipeline_mode<synchronous>, transform_indices = @transform_3, window_bounds = array<i64: 32, 16>}, {pipeline_mode = #tpu.pipeline_mode<synchronous>, transform_indices = @transform_4, window_bounds = array<i64: 32, 1>}, {pipeline_mode = #tpu.pipeline_mode<synchronous>, transform_indices = @transform_5, window_bounds = array<i64: 4, 32>}, {pipeline_mode = #tpu.pipeline_mode<synchronous>, transform_indices = @transform_6, window_bounds = array<i64: 4, 1>}, {transform_indices = @transform_7, window_bounds = array<i64: 4, 128>}]} {
    %c0 = arith.constant 0 : index
    %c0_0 = arith.constant 0 : index
    %0 = vector.load %arg1[%c0, %c0_0] : memref<4x128xf32, #tpu.memory_space<vmem>>, vector<4x128xf32>
    %c0_1 = arith.constant 0 : index
    %c0_2 = arith.constant 0 : index
    %1 = vector.load %arg2[%c0_1, %c0_2] : memref<16x4xf32, #tpu.memory_space<vmem>>, vector<16x4xf32>
    %cst = arith.constant dense<0.000000e+00> : vector<16x128xf32>
    %2 = tpu.matmul %1, %0, %cst {dimension_numbers = #tpu.dot_dimension_numbers<[1], [0], [0], [1], [0, 0, 1, 1], [], []>} : vector<16x4xf32>, vector<4x128xf32>, vector<16x128xf32> -> vector<16x128xf32>
    %c0_3 = arith.constant 0 : index
    %c0_4 = arith.constant 0 : index
    %3 = vector.load %arg3[%c0_3, %c0_4] : memref<16x1xf32, #tpu.memory_space<vmem>>, vector<16x1xf32>
    %4 = vector.broadcast %3 : vector<16x1xf32> to vector<16x128xf32>
    %5 = arith.addf %2, %4 : vector<16x128xf32>
    %cst_5 = arith.constant 0.000000e+00 : f32
    %6 = vector.broadcast %cst_5 : f32 to vector<16x128xf32>
    %7 = arith.maximumf %5, %6 : vector<16x128xf32>
    %c0_6 = arith.constant 0 : index
    %c0_7 = arith.constant 0 : index
    %8 = vector.load %arg4[%c0_6, %c0_7] : memref<32x16xf32, #tpu.memory_space<vmem>>, vector<32x16xf32>
    %cst_8 = arith.constant dense<0.000000e+00> : vector<32x128xf32>
    %9 = tpu.matmul %8, %7, %cst_8 {dimension_numbers = #tpu.dot_dimension_numbers<[1], [0], [0], [1], [0, 0, 1, 1], [], []>} : vector<32x16xf32>, vector<16x128xf32>, vector<32x128xf32> -> vector<32x128xf32>
    %c0_9 = arith.constant 0 : index
    %c0_10 = arith.constant 0 : index
    %10 = vector.load %arg5[%c0_9, %c0_10] : memref<32x1xf32, #tpu.memory_space<vmem>>, vector<32x1xf32>
    %11 = vector.broadcast %10 : vector<32x1xf32> to vector<32x128xf32>
    %12 = arith.addf %9, %11 : vector<32x128xf32>
    %cst_11 = arith.constant 0.000000e+00 : f32
    %13 = vector.broadcast %cst_11 : f32 to vector<32x128xf32>
    %14 = arith.maximumf %12, %13 : vector<32x128xf32>
    %c0_12 = arith.constant 0 : index
    %c0_13 = arith.constant 0 : index
    %15 = vector.load %arg6[%c0_12, %c0_13] : memref<4x32xf32, #tpu.memory_space<vmem>>, vector<4x32xf32>
    %cst_14 = arith.constant dense<0.000000e+00> : vector<4x128xf32>
    %16 = tpu.matmul %15, %14, %cst_14 {dimension_numbers = #tpu.dot_dimension_numbers<[1], [0], [0], [1], [0, 0, 1, 1], [], []>} : vector<4x32xf32>, vector<32x128xf32>, vector<4x128xf32> -> vector<4x128xf32>
    %c0_15 = arith.constant 0 : index
    %c0_16 = arith.constant 0 : index
    %17 = vector.load %arg7[%c0_15, %c0_16] : memref<4x1xf32, #tpu.memory_space<vmem>>, vector<4x1xf32>
    %18 = vector.broadcast %17 : vector<4x1xf32> to vector<4x128xf32>
    %19 = arith.addf %16, %18 : vector<4x128xf32>
    %c0_17 = arith.constant 0 : index
    %c0_18 = arith.constant 0 : index
    %20 = vector.load %arg8[%c0_17, %c0_18] : memref<4x128xf32, #tpu.memory_space<vmem>>, vector<4x128xf32>
    tpu.vector_store %arg8[%c0_17, %c0_18], %19 {strides = array<i32>} : memref<4x128xf32, #tpu.memory_space<vmem>>, vector<4x128xf32>,
    return
  }
  func.func @transform_0(%arg0: i32) -> (i32, i32) {
    %c0_i32 = arith.constant 0 : i32
    %c0_i32_0 = arith.constant 0 : i32
    return %c0_i32, %arg0 : i32, i32
  }
  func.func @transform_1(%arg0: i32) -> (i32, i32) {
    %c0_i32 = arith.constant 0 : i32
    %c0_i32_0 = arith.constant 0 : i32
    %c0_i32_1 = arith.constant 0 : i32
    return %c0_i32, %c0_i32_0 : i32, i32
  }
  func.func @transform_2(%arg0: i32) -> (i32, i32) {
    %c0_i32 = arith.constant 0 : i32
    %c0_i32_0 = arith.constant 0 : i32
    %c0_i32_1 = arith.constant 0 : i32
    return %c0_i32, %c0_i32_0 : i32, i32
  }
  func.func @transform_3(%arg0: i32) -> (i32, i32) {
    %c0_i32 = arith.constant 0 : i32
    %c0_i32_0 = arith.constant 0 : i32
    %c0_i32_1 = arith.constant 0 : i32
    return %c0_i32, %c0_i32_0 : i32, i32
  }
  func.func @transform_4(%arg0: i32) -> (i32, i32) {
    %c0_i32 = arith.constant 0 : i32
    %c0_i32_0 = arith.constant 0 : i32
    %c0_i32_1 = arith.constant 0 : i32
    return %c0_i32, %c0_i32_0 : i32, i32
  }
  func.func @transform_5(%arg0: i32) -> (i32, i32) {
    %c0_i32 = arith.constant 0 : i32
    %c0_i32_0 = arith.constant 0 : i32
    %c0_i32_1 = arith.constant 0 : i32
    return %c0_i32, %c0_i32_0 : i32, i32
  }
  func.func @transform_6(%arg0: i32) -> (i32, i32) {
    %c0_i32 = arith.constant 0 : i32
    %c0_i32_0 = arith.constant 0 : i32
    %c0_i32_1 = arith.constant 0 : i32
    return %c0_i32, %c0_i32_0 : i32, i32
  }
  func.func @transform_7(%arg0: i32) -> (i32, i32) {
    %c0_i32 = arith.constant 0 : i32
    %c0_i32_0 = arith.constant 0 : i32
    return %c0_i32, %arg0 : i32, i32
  }
}

</mosaic_0001>

<bundles_post_ra>
// kernel: tpu_custom_call.1
= control target key start
LH: loop header
LB: loop body
LE: loop exit
PB: predicated region body
PF: predicated region fallthrough
CT: control target
= control target key end

     0   :  { %vm49_vm0 = vcmask 1043456   ;;  %v241_v3 = vmov 0   ;;  %vm42_vm1 = vcmask 31744   ;;  %s331_s0 = inlined_call_operand.vmem [shape: f32[4,128], index: 0, kind: input, shape index: {}]   ;;  %s332_s1 = inlined_call_operand.vmem [shape: f32[16,4], index: 1, kind: input, shape index: {}]   ;;  %s333_s2 = inlined_call_operand.vmem [shape: f32[16,1], index: 2, kind: input, shape index: {}]   ;;  %s334_s3 = inlined_call_operand.vmem [shape: f32[32,16], index: 3, kind: input, shape index: {}]   ;;  %s335_s4 = inlined_call_operand.vmem [shape: f32[32,1], index: 4, kind: input, shape index: {}]   ;;  %s336_s5 = inlined_call_operand.vmem [shape: f32[4,32], index: 5, kind: input, shape index: {}]   ;;  %s337_s6 = inlined_call_operand.vmem [shape: f32[4,1], index: 6, kind: input, shape index: {}]   ;;  %s338_s7 = inlined_call_operand.hbm [shape: f32[4,128], index: 7, kind: output, shape index: {}]  }
   0x1   :  { %v27_v0 = vld [vmem:[%s331_s0] sm:$0xf]  ;;  %v31_v1 = vld [vmem:[%s333_s2 + $0x8] sm:$0xff]  ;;  %212 = vset.pattern.permute.xlu0 %v241_v3 }
   0x2   :  { %v28_v2 = vld [vmem:[%s332_s1] sm:$0xff]  ;;  %200 = vmatpush.msk.msra.mxu0 %vm49_vm0, %v27_v0  ;;  %39 = vperm.xlu0 %212, %v31_v1  }
   0x3   :  { %201 = vmatmul.msk.f32.vlgmr.msra.gmra.mxu0 %vm42_vm1, %v28_v2 }
   0x4   :  { %12 = vsyncpa [#allocation3], 0  ;;  %213 = vset.pattern.permute.xlu1 %v241_v3  ;;  %214 = vset.pattern.permute.xlu2 %v241_v3  ;;  %v30_v4 = vld [vmem:[%s333_s2] sm:$0xff]  ;;  %v29_v5 = vld [vmem:[%s332_s1 + $0x8] sm:$0xff]  ;;  %vm106_vm2 = vcmask 130048   ;;  %vm159_vm3 = vcmask 261120  }
   0x5   :  { %v153_v6 = vld [vmem:[%s337_s6] sm:$0xf]  ;;  %v85_v7 = vld [vmem:[%s335_s4 + $0x18] sm:$0xff]  ;;  %v83_v8 = vld [vmem:[%s335_s4 + $0x8] sm:$0xff]  ;;  %s242_s25 = smov [#allocation2]   ;;  %s191_s29 = sshll.u32 %s338_s7, 4  ;;  %s192_s29 = int_to_ptr.hbm [resolvable:$true] %s191_s29 }
   0x6   :  { %103 = vperm.xlu1 %213, %v85_v7   ;;  %93 = vperm.xlu2 %214, %v83_v8   ;;  %v84_v10 = vld [vmem:[%s335_s4 + $0x10] sm:$0xff]  ;;  %v82_v11 = vld [vmem:[%s335_s4] sm:$0xff]  ;;  %v81_v21 = vld [vmem:[%s334_s3 + $0x18] sm:$0xff]  ;;  %s189_s26 = sshll.u32 %s242_s25, 4  ;;  %s190_s26 = int_to_ptr.vmem [resolvable:$true] %s189_s26 }
   0x7   :  { %v80_v19 = vld [vmem:[%s334_s3 + $0x10] sm:$0xff]  ;;  %v78_v20 = vld [vmem:[%s334_s3] sm:$0xff]  ;;  %v79_v22 = vld [vmem:[%s334_s3 + $0x8] sm:$0xff] }
   0x8   :  { %v152_v39 = vld [vmem:[%s336_s5] sm:$0xf] }
   0xa   :  { %34 = vperm.xlu0 %212, %v30_v4  }
   0xb   :  { %202 = vmatmul.msk.f32.gmra.mxu0 %vm42_vm1, %v29_v5 }
   0xe   :  { %98 = vperm.xlu1 %213, %v84_v10   ;;  %88 = vperm.xlu2 %214, %v82_v11  }
  0x12   :  { %156 = vperm.xlu0 %212, %v153_v6  }
  0x60   :  { %v94_v25 = vpop.permute.xlu2 %93 }
  0x68   :  { %v89_v32 = vpop.permute.xlu2 %88 }
  0x74   :  { %v40_v9 = vpop.permute.xlu0 %39 }
  0x78   :  { %v104_v23 = vpop.permute.xlu1 %103 }
  0x7c   :  { %v35_v13 = vpop.permute.xlu0 %34 }
  0x80   :  { %v70_v12 = vpop.f32.mrf.mxu0  ;;  %v99_v27 = vpop.permute.xlu1 %98 }
  0x81   :  { %v71_v15 = vadd.f32 %v70_v12, %v35_v13 }
  0x83   :  { %v76_v18 = vmax.f32 %v71_v15, 0.0 }
  0x84   :  { %v157_v40 = vpop.permute.xlu0 %156 }
  0x88   :  { %v73_v14 = vpop.f32.mrf.mxu0 }
  0x89   :  { %v74_v16 = vadd.f32 %v73_v14, %v40_v9 }
  0x8b   :  { %v77_v17 = vmax.f32 %v74_v16, 0.0 }
  0x8d   :  { %133 = vmatpush.msra.mxu1 %v77_v17  ;;  %208 = vmatpush.msra.mxu3 %v77_v17 }
  0x8f   :  { %134 = vmatpush.msra.mxu1 %v76_v18  ;;  %209 = vmatpush.msra.mxu3 %v76_v18 }
  0x90   :  { %205 = vmatmul.msk.f32.vlgmr.msra.gmra.mxu3 %vm106_vm2, %v80_v19  ;;  %203 = vmatmul.msk.f32.vlgmr.msra.gmra.mxu1 %vm106_vm2, %v78_v20 }
  0x98   :  { %206 = vmatmul.msk.f32.gmra.mxu3 %vm106_vm2, %v81_v21  ;;  %204 = vmatmul.msk.f32.gmra.mxu1 %vm106_vm2, %v79_v22 }
 0x10d   :  { %v136_v24 = vpop.f32.mrf.mxu1 }
 0x10e   :  { %v137_v36 = vadd.f32 %v136_v24, %v89_v32 }
 0x110   :  { %v148_v38 = vmax.f32 %v137_v36, 0.0 }
 0x113   :  { %v142_v26 = vpop.f32.mrf.mxu3 }
 0x114   :  { %v143_v30 = vadd.f32 %v142_v26, %v99_v27 }
 0x115   :  { %v139_v28 = vpop.f32.mrf.mxu1 }
 0x116   :  { %v140_v33 = vadd.f32 %v139_v28, %v94_v25  ;;  %v150_v35 = vmax.f32 %v143_v30, 0.0 }
 0x118   :  { %v149_v37 = vmax.f32 %v140_v33, 0.0 }
 0x11b   :  { %v145_v29 = vpop.f32.mrf.mxu3 }
 0x11c   :  { %v146_v31 = vadd.f32 %v145_v29, %v104_v23 }
 0x11e   :  { %v151_v34 = vmax.f32 %v146_v31, 0.0 }
 0x120   :  { %175 = vmatpush.msra.mxu2 %v151_v34 }
 0x122   :  { %176 = vmatpush.msra.mxu2 %v150_v35 }
 0x124   :  { %177 = vmatpush.msra.mxu2 %v149_v37 }
 0x126   :  { %178 = vmatpush.msra.mxu2 %v148_v38 }
 0x127   :  { %207 = vmatmul.msk.f32.vlgmr.msra.gmra.mxu2 %vm159_vm3, %v152_v39 }
 0x1aa   :  { %v180_v41 = vpop.f32.mrf.mxu2 }
 0x1ab   :  { %v181_v42 = vadd.f32 %v180_v41, %v157_v40 }
 0x1ad   :  { %183 = vst [vmem:[#allocation2] sm:$0xf] %v181_v42 }
 0x1ae   :  { %194 = dma.vmem_to_hbm [thread:$0]  %s190_s26, 64, %s192_s29, [#allocation3]  }
 0x1af   :  { %239 = dma.done.wait [#allocation3], 64  }
 0x1b0   :  { %240 = vsyncadd [#allocation3], 4294967232 }
 0x1b1   :  { %199 = vsyncpa [#allocation3], 1 }

</bundles_post_ra>
